<compile_context>
chip_gen: v7x
topology: tpu7x:2x2x1
jax: 0.10.0
libtpu: 0.0.40
codegen_flags: <defaults>
</compile_context>

<pallas_src>
import functools
import math
import random

import jax
import jax.numpy as jnp
from jax.experimental import pallas as pl
from jax.experimental.pallas import tpu as pltpu

_TILE_ROWS = 4096               # 4096 x 128 uint8 = 512 KiB per pipeline buffer
_LN255 = math.log(255.0)

_COMPILER_PARAMS = pltpu.CompilerParams(
    dimension_semantics=("parallel",),
    vmem_limit_bytes=32 * 1024 * 1024,
)


# ---------------------------------------------------------------------------
# Per-block apply functions (operate on a (R, 128) uint8 tile)
# ---------------------------------------------------------------------------
def _apply_lut_take(x_u8, tab_ref):
    """LUT via 1-D table gather: out = lut[x]."""
    lut = tab_ref[...]                                    # int32[256] in VMEM
    xi = x_u8.astype(jnp.int32)
    y = jnp.take(lut, xi, axis=0, mode="promise_in_bounds")
    return y.astype(jnp.uint8)


def _apply_lut_split(x_u8, tab_ref):
    """LUT via two 128-wide lane gathers (take_along_axis) + select on the high bit."""
    lut = tab_ref[...]                                    # int32[256] in VMEM
    xi = x_u8.astype(jnp.int32)
    r = x_u8.shape[0]
    lo_tbl = jnp.broadcast_to(lut[:128][None, :], (r, 128))
    hi_tbl = jnp.broadcast_to(lut[128:][None, :], (r, 128))
    low = jnp.bitwise_and(xi, 127)
    g_lo = jnp.take_along_axis(lo_tbl, low, axis=1, mode="promise_in_bounds")
    g_hi = jnp.take_along_axis(hi_tbl, low, axis=1, mode="promise_in_bounds")
    return jnp.where(xi >= 128, g_hi, g_lo).astype(jnp.uint8)


def _apply_eup(x_u8, tab_ref):
    """Fallback: clip((x/255)**g*255) via exp(g*log(x) + (1-g)*ln255) on the EUP."""
    g = tab_ref[0]                                        # f32[2] in SMEM
    bias = tab_ref[1]
    x = x_u8.astype(jnp.float32)
    y = jnp.exp(g * jnp.log(jnp.maximum(x, 1.0)) + bias)
    y = jnp.where(x > 0.0, y, 0.0)                        # 0**g == 0 for g > 0
    y = jnp.clip(y, 0.0, 255.0)
    return y.astype(jnp.uint8)


_APPLY = {"take": _apply_lut_take, "tala": _apply_lut_split, "eup": _apply_eup}


# ---------------------------------------------------------------------------
# Kernel factories
# ---------------------------------------------------------------------------
def _make_pair_kernel(mode):
    fn = _APPLY[mode]

    def kernel(tab_ref, a_ref, b_ref, oa_ref, ob_ref):
        oa_ref[...] = fn(a_ref[...], tab_ref)
        ob_ref[...] = fn(b_ref[...], tab_ref)

    return kernel


def _make_single_kernel(mode):
    fn = _APPLY[mode]

    def kernel(tab_ref, x_ref, o_ref):
        o_ref[...] = fn(x_ref[...], tab_ref)

    return kernel


def _tab_spec(mode):
    space = pltpu.MemorySpace.SMEM if mode == "eup" else pltpu.MemorySpace.VMEM
    return pl.BlockSpec(memory_space=space)


def _cost(mode, n_elems):
    return pl.CostEstimate(
        flops=10 * n_elems,
        transcendentals=(2 * n_elems if mode == "eup" else 0),
        bytes_accessed=2 * n_elems + 1024,
    )


# ---------------------------------------------------------------------------
# pallas_call wrappers
# ---------------------------------------------------------------------------
@functools.partial(jax.jit, static_argnums=0)
def _run_pair(mode, tab, a2d, b2d):
    rows = a2d.shape[0]
    tr = min(_TILE_ROWS, rows)
    grid = (pl.cdiv(rows, tr),)
    tile = pl.BlockSpec((tr, 128), lambda i: (i, 0))
    return pl.pallas_call(
        _make_pair_kernel(mode),
        out_shape=(jax.ShapeDtypeStruct(a2d.shape, jnp.uint8),
                   jax.ShapeDtypeStruct(b2d.shape, jnp.uint8)),
        grid=grid,
        in_specs=[_tab_spec(mode), tile, tile],
        out_specs=(tile, tile),
        compiler_params=_COMPILER_PARAMS,
        cost_estimate=_cost(mode, a2d.size + b2d.size),
    )(tab, a2d, b2d)


@functools.partial(jax.jit, static_argnums=0)
def _run_single(mode, tab, x2d):
    rows = x2d.shape[0]
    tr = min(_TILE_ROWS, rows)
    grid = (pl.cdiv(rows, tr),)
    tile = pl.BlockSpec((tr, 128), lambda i: (i, 0))
    return pl.pallas_call(
        _make_single_kernel(mode),
        out_shape=jax.ShapeDtypeStruct(x2d.shape, jnp.uint8),
        grid=grid,
        in_specs=[_tab_spec(mode), tile],
        out_specs=tile,
        compiler_params=_COMPILER_PARAMS,
        cost_estimate=_cost(mode, x2d.size),
    )(tab, x2d)


# ---------------------------------------------------------------------------
# Gather-support probe (decides LUT vs EUP path once, cached)
# ---------------------------------------------------------------------------
_MODE_CACHE = []


def _get_mode():
    if not _MODE_CACHE:
        probe_x = jnp.zeros((8, 128), dtype=jnp.uint8)
        probe_lut = jnp.arange(256, dtype=jnp.int32)
        mode = "eup"
        for cand in ("take", "tala"):
            try:
                jax.block_until_ready(_run_single(cand, probe_lut, probe_x))
                mode = cand
                break
            except Exception:   # lowering / compile failure -> try next variant
                continue
        _MODE_CACHE.append(mode)
    return _MODE_CACHE[0]


# ---------------------------------------------------------------------------
# Wrappers (no pad / no post-kernel slice copies)
# ---------------------------------------------------------------------------
def _split_slab(img):
    """Return (main (rows,128) slab or None, ragged tail (<128 elems), orig shape)."""
    shape = img.shape
    flat = jnp.asarray(img, dtype=jnp.uint8).reshape(-1)
    total = flat.shape[0]
    rows = total // 128
    main = flat[: rows * 128].reshape(rows, 128) if rows > 0 else None
    tail = flat[rows * 128:]
    return main, tail, shape


def _tail_apply(tail_u8, mode, tab, gamma):
    if tail_u8.size == 0:
        return tail_u8
    if mode == "eup":
        y = (tail_u8.astype(jnp.float32) / 255.0) ** gamma * 255.0
        return jnp.clip(y, 0.0, 255.0).astype(jnp.uint8)
    return jnp.take(tab, tail_u8.astype(jnp.int32), axis=0).astype(jnp.uint8)


def _merge(main_out, tail_out, orig_shape):
    if main_out is None:
        flat = tail_out
    elif tail_out.size == 0:
        flat = main_out.reshape(-1)
    else:
        flat = jnp.concatenate([main_out.reshape(-1), tail_out])
    return flat.reshape(orig_shape)


def gamma_correct_images(a_img, b_img, gamma):
    """Apply the same gamma to two uint8 images; fused into one launch when possible."""
    mode = _get_mode()
    if mode == "eup":
        tab = jnp.array([gamma, (1.0 - gamma) * _LN255], dtype=jnp.float32)
    else:
        levels = jnp.arange(256, dtype=jnp.float32)
        tab = jnp.clip((levels / 255.0) ** gamma * 255.0, 0.0, 255.0).astype(jnp.int32)

    a_main, a_tail, a_shape = _split_slab(a_img)
    b_main, b_tail, b_shape = _split_slab(b_img)

    if (a_main is not None) and (b_main is not None) and a_main.shape == b_main.shape:
        a_mo, b_mo = _run_pair(mode, tab, a_main, b_main)
    else:
        a_mo = _run_single(mode, tab, a_main) if a_main is not None else None
        b_mo = _run_single(mode, tab, b_main) if b_main is not None else None

    a_to = _tail_apply(a_tail, mode, tab, gamma)
    b_to = _tail_apply(b_tail, mode, tab, gamma)
    return _merge(a_mo, a_to, a_shape), _merge(b_mo, b_to, b_shape)


def gamma_correction_forward(a_img, b_img, target,
                             gamma_range=(0.7, 1.5), prob=0.5, rng=None):
    """JAX/Pallas equivalent of GammaCorrection.forward (host RNG gate, no device sync)."""
    rng = rng if rng is not None else random
    if rng.random() < prob:
        gamma = rng.uniform(gamma_range[0], gamma_range[1])
        a_img, b_img = gamma_correct_images(a_img, b_img, gamma)
        # The module's second clip(...).astype(uint8) is a no-op on clipped uint8 data.
    return a_img, b_img, target


# ---------------------------------------------------------------------------
# Demo / self-check
# ---------------------------------------------------------------------------
def _ref_gamma(x, gamma):
    y = (x.astype(jnp.float32) / 255.0) ** gamma * 255.0
    return jnp.clip(y, 0.0, 255.0).astype(jnp.uint8)


def _check(a_img, b_img, seed):
    rng = random.Random(seed)
    a_out, b_out, _ = gamma_correction_forward(
        a_img, b_img, {"label": 0}, gamma_range=(0.7, 1.5), prob=1.0, rng=rng)
    jax.block_until_ready((a_out, b_out))

    assert a_out.shape == a_img.shape and a_out.dtype == jnp.uint8
    assert b_out.shape == b_img.shape and b_out.dtype == jnp.uint8

    # Replay the host RNG draws; allow 1 LSB (exact for the LUT path,
    # <=1 LSB for the exp/log fallback at truncation boundaries).
    rng_ref = random.Random(seed)
    rng_ref.random()
    gamma = rng_ref.uniform(0.7, 1.5)
    da = int(jnp.max(jnp.abs(a_out.astype(jnp.int32) - _ref_gamma(a_img, gamma).astype(jnp.int32))))
    db = int(jnp.max(jnp.abs(b_out.astype(jnp.int32) - _ref_gamma(b_img, gamma).astype(jnp.int32))))
    assert da <= 1 and db <= 1, (da, db)


if __name__ == "__main__":
    key = jax.random.PRNGKey(0)
    k_a, k_b, k_c, k_d = jax.random.split(key, 4)

    # Main test: two NCHW uint8 "images", size divisible by 128 (pure Pallas path).
    a_img = jax.random.randint(k_a, (2, 4, 16, 16), 0, 256, dtype=jnp.int32).astype(jnp.uint8)
    b_img = jax.random.randint(k_b, (2, 4, 16, 16), 0, 256, dtype=jnp.int32).astype(jnp.uint8)
    _check(a_img, b_img, seed=0)

    # Ragged test: 1200 elements -> 9 full (., 128) rows via Pallas + 48-elem jnp tail.
    a2 = jax.random.randint(k_c, (1, 3, 20, 20), 0, 256, dtype=jnp.int32).astype(jnp.uint8)
    b2 = jax.random.randint(k_d, (1, 3, 20, 20), 0, 256, dtype=jnp.int32).astype(jnp.uint8)
    _check(a2, b2, seed=1)

    print("KERNEL_OK")
</pallas_src>

<mosaic_0001>
module attributes {stable_mosaic.version = 11 : i64} {
  func.func @kernel(%arg0: i32, %arg1: memref<2xf32, #tpu.memory_space<smem>>, %arg2: memref<16x128xi8, #tpu.memory_space<vmem>>, %arg3: memref<16x128xi8, #tpu.memory_space<vmem>>, %arg4: memref<16x128xi8, #tpu.memory_space<vmem>>, %arg5: memref<16x128xi8, #tpu.memory_space<vmem>>) attributes {dimension_semantics = [#tpu.dimension_semantics<parallel>], iteration_bounds = array<i64: 1>, scalar_prefetch = 0 : i64, scratch_operands = 0 : i64, tpu.core_type = #tpu.core_type<tc>, window_params = [{transform_indices = @transform_0, window_bounds = array<i64: 2>}, {transform_indices = @transform_1, window_bounds = array<i64: 16, 128>}, {transform_indices = @transform_2, window_bounds = array<i64: 16, 128>}, {transform_indices = @transform_3, window_bounds = array<i64: 16, 128>}, {transform_indices = @transform_4, window_bounds = array<i64: 16, 128>}]} {
    %c0 = arith.constant 0 : index
    %c0_0 = arith.constant 0 : index
    %0 = vector.load %arg2[%c0, %c0_0] : memref<16x128xi8, #tpu.memory_space<vmem>>, vector<16x128xi8>
    %c0_1 = arith.constant 0 : index
    %1 = memref.load %arg1[%c0_1] : memref<2xf32, #tpu.memory_space<smem>>
    %c1 = arith.constant 1 : index
    %2 = memref.load %arg1[%c1] : memref<2xf32, #tpu.memory_space<smem>>
    %3 = arith.uitofp %0 : vector<16x128xi8> to vector<16x128xf32>
    %cst = arith.constant 1.000000e+00 : f32
    %4 = vector.broadcast %cst : f32 to vector<16x128xf32>
    %5 = arith.maximumf %3, %4 : vector<16x128xf32>
    %6 = math.log %5 : vector<16x128xf32>
    %7 = vector.broadcast %1 : f32 to vector<16x128xf32>
    %8 = arith.mulf %7, %6 : vector<16x128xf32>
    %9 = vector.broadcast %2 : f32 to vector<16x128xf32>
    %10 = arith.addf %8, %9 : vector<16x128xf32>
    %11 = math.exp %10 : vector<16x128xf32>
    %cst_2 = arith.constant 0.000000e+00 : f32
    %12 = vector.broadcast %cst_2 : f32 to vector<16x128xf32>
    %13 = arith.cmpf ogt, %3, %12 : vector<16x128xf32>
    %cst_3 = arith.constant 0.000000e+00 : f32
    %14 = vector.broadcast %cst_3 : f32 to vector<16x128xf32>
    %15 = arith.select %13, %11, %14 : vector<16x128xi1>, vector<16x128xf32>
    %cst_4 = arith.constant 0.000000e+00 : f32
    %cst_5 = arith.constant 2.550000e+02 : f32
    %16 = vector.broadcast %cst_4 : f32 to vector<16x128xf32>
    %17 = arith.maximumf %16, %15 : vector<16x128xf32>
    %18 = vector.broadcast %cst_5 : f32 to vector<16x128xf32>
    %19 = arith.minimumf %18, %17 : vector<16x128xf32>
    %20 = arith.fptoui %19 : vector<16x128xf32> to vector<16x128xi8>
    %c0_6 = arith.constant 0 : index
    %c0_7 = arith.constant 0 : index
    %21 = vector.load %arg4[%c0_6, %c0_7] : memref<16x128xi8, #tpu.memory_space<vmem>>, vector<16x128xi8>
    tpu.vector_store %arg4[%c0_6, %c0_7], %20 {strides = array<i32>} : memref<16x128xi8, #tpu.memory_space<vmem>>, vector<16x128xi8>,
    %c0_8 = arith.constant 0 : index
    %c0_9 = arith.constant 0 : index
    %22 = vector.load %arg3[%c0_8, %c0_9] : memref<16x128xi8, #tpu.memory_space<vmem>>, vector<16x128xi8>
    %c0_10 = arith.constant 0 : index
    %23 = memref.load %arg1[%c0_10] : memref<2xf32, #tpu.memory_space<smem>>
    %c1_11 = arith.constant 1 : index
    %24 = memref.load %arg1[%c1_11] : memref<2xf32, #tpu.memory_space<smem>>
    %25 = arith.uitofp %22 : vector<16x128xi8> to vector<16x128xf32>
    %cst_12 = arith.constant 1.000000e+00 : f32
    %26 = vector.broadcast %cst_12 : f32 to vector<16x128xf32>
    %27 = arith.maximumf %25, %26 : vector<16x128xf32>
    %28 = math.log %27 : vector<16x128xf32>
    %29 = vector.broadcast %23 : f32 to vector<16x128xf32>
    %30 = arith.mulf %29, %28 : vector<16x128xf32>
    %31 = vector.broadcast %24 : f32 to vector<16x128xf32>
    %32 = arith.addf %30, %31 : vector<16x128xf32>
    %33 = math.exp %32 : vector<16x128xf32>
    %cst_13 = arith.constant 0.000000e+00 : f32
    %34 = vector.broadcast %cst_13 : f32 to vector<16x128xf32>
    %35 = arith.cmpf ogt, %25, %34 : vector<16x128xf32>
    %cst_14 = arith.constant 0.000000e+00 : f32
    %36 = vector.broadcast %cst_14 : f32 to vector<16x128xf32>
    %37 = arith.select %35, %33, %36 : vector<16x128xi1>, vector<16x128xf32>
    %cst_15 = arith.constant 0.000000e+00 : f32
    %cst_16 = arith.constant 2.550000e+02 : f32
    %38 = vector.broadcast %cst_15 : f32 to vector<16x128xf32>
    %39 = arith.maximumf %38, %37 : vector<16x128xf32>
    %40 = vector.broadcast %cst_16 : f32 to vector<16x128xf32>
    %41 = arith.minimumf %40, %39 : vector<16x128xf32>
    %42 = arith.fptoui %41 : vector<16x128xf32> to vector<16x128xi8>
    %c0_17 = arith.constant 0 : index
    %c0_18 = arith.constant 0 : index
    %43 = vector.load %arg5[%c0_17, %c0_18] : memref<16x128xi8, #tpu.memory_space<vmem>>, vector<16x128xi8>
    tpu.vector_store %arg5[%c0_17, %c0_18], %42 {strides = array<i32>} : memref<16x128xi8, #tpu.memory_space<vmem>>, vector<16x128xi8>,
    return
  }
  func.func @transform_0(%arg0: i32) -> i32 {
    %c0_i32 = arith.constant 0 : i32
    %c0_i32_0 = arith.constant 0 : i32
    return %c0_i32 : i32
  }
  func.func @transform_1(%arg0: i32) -> (i32, i32) {
    %c0_i32 = arith.constant 0 : i32
    %c0_i32_0 = arith.constant 0 : i32
    return %arg0, %c0_i32 : i32, i32
  }
  func.func @transform_2(%arg0: i32) -> (i32, i32) {
    %c0_i32 = arith.constant 0 : i32
    %c0_i32_0 = arith.constant 0 : i32
    return %arg0, %c0_i32 : i32, i32
  }
  func.func @transform_3(%arg0: i32) -> (i32, i32) {
    %c0_i32 = arith.constant 0 : i32
    %c0_i32_0 = arith.constant 0 : i32
    return %arg0, %c0_i32 : i32, i32
  }
  func.func @transform_4(%arg0: i32) -> (i32, i32) {
    %c0_i32 = arith.constant 0 : i32
    %c0_i32_0 = arith.constant 0 : i32
    return %arg0, %c0_i32 : i32, i32
  }
}

</mosaic_0001>

<bundles_post_ra>
// kernel: _run_pair.1
= control target key start
LH: loop header
LB: loop body
LE: loop exit
PB: predicated region body
PF: predicated region fallthrough
CT: control target
= control target key end

     0   :  { %10 = vsyncpa [#allocation5], 0  ;;  %s391_s0 = inlined_call_operand.hbm [shape: f32[2], index: 0, kind: input, shape index: {}]   ;;  %s392_s1 = inlined_call_operand.hbm [shape: u8[16,128], index: 1, kind: input, shape index: {}]   ;;  %s393_s2 = inlined_call_operand.vmem [shape: u8[16,128], index: 2, kind: input, shape index: {}]   ;;  %s394_s3 = inlined_call_operand.hbm [shape: u8[16,128], index: 3, kind: output, shape index: {0}]   ;;  %s395_s4 = inlined_call_operand.hbm [shape: u8[16,128], index: 4, kind: output, shape index: {1}]  }
   0x1   :  { %11 = vsyncpa [#allocation3], 0 }
   0x2   :  { %12 = vsyncpa [#allocation4], 0 }
   0x3   :  { %13 = vsyncpa [#allocation9], 0  ;;  %s209_s17 = scalar_lea.hbm %s391_s0, 16 }
   0x4   :  { %p210_p0 = scmp.ne.s32.totalorder %s391_s0, %s209_s17  ;;  %p213_p1 = scmp.lt.u32.totalorder %s209_s17, %s391_s0 }
   0x6   :  { %p215_p2 = pnand %p213_p1, %p210_p0 }
   0x8   :  { %218 = shalt.err (!%p215_p2)
}
   0x9   :  { %s293_s22 = smov [#allocation2]   ;;  %s294_s25 = smov [#allocation6]  }
   0xa   :  { %21 = dma.hbm_to_smem %s391_s0, 16, %s293_s22, [#allocation5]  }
   0xb   :  { %s27_s26 = sshll.u32 %s294_s25, 4  ;;  %s219_s29 = scalar_lea.hbm %s392_s1, 64  ;;  %s28_s26 = int_to_ptr.vmem [resolvable:$true] %s27_s26 }
   0xc   :  { %p220_p3 = scmp.ne.s32.totalorder %s392_s1, %s219_s29  ;;  %p223_p4 = scmp.lt.u32.totalorder %s219_s29, %s392_s1 }
   0xe   :  { %p225_p5 = pnand %p223_p4, %p220_p3 }
  0x10   :  { %228 = shalt.err (!%p225_p5)
}
  0x11   :  { %s229_s8 = scalar_lea.vmem %s28_s26, 64  ;;  %p234_p7 = scmp.lt.s32.totalorder %s28_s26, %s28_s26 }
  0x12   :  { %p230_p6 = scmp.ne.s32.totalorder %s28_s26, %s229_s8  ;;  %p235_p8 = scmp.lt.s32.totalorder %s229_s8, %s229_s8 }
  0x14   :  { %p236_p9 = por %p235_p8, %p234_p7 }
  0x16   :  { %p237_p10 = pnand %p236_p9, %p230_p6 }
  0x18   :  { %240 = shalt.err (!%p237_p10)
}
  0x19   :  { %s295_s0 = smov 32   ;;  %s296_s9 = smov 2  }
  0x1a   :  { %33 = dma.hbm_to_vmem [thread:$0]  %s392_s1, 64, %s28_s26, [#allocation3], %s295_s0, %s295_s0, %s296_s9  }
  0x1b   :  { %285 = dma.done.wait [#allocation5], 16  }
  0x1c   :  { %286 = vsyncadd [#allocation5], 4294967280 }
  0x1d   :  { %287 = dma.done.wait [#allocation3], 64  }
  0x1e   :  { %288 = vsyncadd [#allocation3], 4294967232 }
  0x1f   :  { %42 = sfence }
  0x20   :  { %v180_v0 = vld [vmem:[#allocation6] sm:$0xf]   ;;  %v184_v3 = vld [vmem:[%s393_s2] sm:$0xf]   ;;  %s45_s1 = sld [smem:[#allocation2]]  ;;  %s177_s2 = sld [smem:[#allocation2 + $0x1]] }
  0x21   :  { %v181_v1 = vunpack.c.0.s8 %v180_v0  ;;  %v182_v2 = vunpack.c.1.s8 %v180_v0  ;;  %v185_v4 = vunpack.c.0.s8 %v184_v3  ;;  %v186_v5 = vunpack.c.1.s8 %v184_v3  ;;  %s297_s14 = smov [#allocation7]   ;;  %s298_s16 = smov [#allocation8]  }
  0x22   :  { %s148_s15 = sshll.u32 %s297_s14, 4  ;;  %s160_s17 = sshll.u32 %s298_s16, 4  ;;  %s149_s15 = int_to_ptr.vmem [resolvable:$true] %s148_s15  ;;  %s354_s17 = int_to_ptr.vmem [resolvable:$true] %s160_s17 }
  0x23   :  { %v49_v6 = vand.u32 255, %v181_v1  ;;  %v50_v7 = vand.u32 255, %v182_v2  ;;  %v99_v8 = vand.u32 255, %v185_v4  ;;  %v100_v9 = vand.u32 255, %v186_v5  ;;  %s241_s18 = scalar_lea.vmem %s149_s15, 64  ;;  %p246_p12 = scmp.lt.s32.totalorder %s149_s15, %s149_s15 }
  0x24   :  { %p242_p11 = scmp.ne.s32.totalorder %s149_s15, %s241_s18  ;;  %p247_p13 = scmp.lt.s32.totalorder %s241_s18, %s241_s18 }
  0x25   :  { %v51_v10 = vcvt.s32.f32 %v49_v6  ;;  %v52_v11 = vcvt.s32.f32 %v50_v7  ;;  %v101_v12 = vcvt.s32.f32 %v99_v8  ;;  %v102_v13 = vcvt.s32.f32 %v100_v9 }
  0x26   :  { %v59_v19 = vstv %s45_s1  ;;  %v62_v24 = vstv %s177_s2  ;;  %p248_p0 = por %p247_p13, %p246_p12 }
  0x27   :  { %v53_v14 = vmax.f32 %v51_v10, 1.0  ;;  %v54_v15 = vmax.f32 %v52_v11, 1.0  ;;  %v103_v16 = vmax.f32 %v101_v12, 1.0  ;;  %v104_v17 = vmax.f32 %v102_v13, 1.0 }
  0x28   :  { %vm69_vm0 = vcmp.gt.f32.partialorder %v51_v10, 0.0  ;;  %vm70_vm1 = vcmp.gt.f32.partialorder %v52_v11, 0.0  ;;  %vm119_vm2 = vcmp.gt.f32.partialorder %v101_v12, 0.0  ;;  %vm120_vm3 = vcmp.gt.f32.partialorder %v102_v13, 0.0  ;;  %p249_p1 = pnand %p248_p0, %p242_p11 }
  0x29   :  { %193 = vlog2.f32 %v53_v14 }
  0x2a   :  { %195 = vlog2.f32 %v54_v15 }
  0x2b   :  { %197 = vlog2.f32 %v103_v16 }
  0x2c   :  { %199 = vlog2.f32 %v104_v17 }
  0x33   :  { %v194_v18 = vpop.eup %193 }
  0x34   :  { %v196_v20 = vpop.eup %195  ;;  %v56_v21 = vmul.f32 0.6931472, %v194_v18 }
  0x35   :  { %v198_v22 = vpop.eup %197  ;;  %v58_v23 = vmul.f32 0.6931472, %v196_v20 }
  0x36   :  { %v200_v25 = vpop.eup %199  ;;  %v60_v26 = vmul.f32 %v59_v19, %v56_v21  ;;  %v106_v27 = vmul.f32 0.6931472, %v198_v22 }
  0x37   :  { %v61_v28 = vmul.f32 %v59_v19, %v58_v23  ;;  %v108_v29 = vmul.f32 0.6931472, %v200_v25 }
  0x38   :  { %v63_v30 = vadd.f32 %v62_v24, %v60_v26  ;;  %v110_v31 = vmul.f32 %v106_v27, %v59_v19 }
  0x39   :  { %v64_v32 = vadd.f32 %v62_v24, %v61_v28  ;;  %v111_v33 = vmul.f32 %v108_v29, %v59_v19 }
  0x3a   :  { %v65_v34 = vmul.f32 1.442695, %v63_v30  ;;  %v113_v35 = vadd.f32 %v110_v31, %v62_v24 }
  0x3b   :  { %v67_v36 = vmul.f32 1.442695, %v64_v32  ;;  %v114_v37 = vadd.f32 %v111_v33, %v62_v24 }
  0x3c   :  { %201 = vpow2.f32 %v65_v34  ;;  %v115_v38 = vmul.f32 1.442695, %v113_v35 }
  0x3d   :  { %203 = vpow2.f32 %v67_v36  ;;  %v117_v39 = vmul.f32 1.442695, %v114_v37 }
  0x3e   :  { %205 = vpow2.f32 %v115_v38 }
  0x3f   :  { %207 = vpow2.f32 %v117_v39 }
  0x46   :  { %v202_v40 = vpop.eup %201 }
  0x47   :  { %v204_v41 = vpop.eup %203  ;;  %v71_v42 = vsel %vm69_vm0, %v202_v40, 0.0 }
  0x48   :  { %v206_v43 = vpop.eup %205  ;;  %v72_v44 = vsel %vm70_vm1, %v204_v41, 0.0  ;;  %v73_v45 = vmax.f32 %v71_v42, 0.0 }
  0x49   :  { %v208_v46 = vpop.eup %207  ;;  %v74_v47 = vmax.f32 %v72_v44, 0.0  ;;  %v121_v48 = vsel %vm119_vm2, %v206_v43, 0.0 }
  0x4a   :  { %v75_v49 = vmin.f32 %v73_v45, 255.0  ;;  %v122_v50 = vsel %vm120_vm3, %v208_v46, 0.0  ;;  %v123_v51 = vmax.f32 %v121_v48, 0.0 }
  0x4b   :  { %v76_v52 = vmin.f32 %v74_v47, 255.0  ;;  %v124_v53 = vmax.f32 %v122_v50, 0.0 }
  0x4c   :  { %v77_v54 = vtrunc.f32 %v75_v49  ;;  %v125_v55 = vmin.f32 %v123_v51, 255.0 }
  0x4d   :  { %v78_v56 = vtrunc.f32 %v76_v52  ;;  %v126_v57 = vmin.f32 %v124_v53, 255.0 }
  0x4e   :  { %v127_v58 = vtrunc.f32 %v125_v55 }
  0x4f   :  { %v79_v59 = vpack.c.f32.eXmY %v77_v54, %v78_v56, 56  ;;  %v128_v60 = vtrunc.f32 %v126_v57 }
  0x51   :  { %v83_v61 = vpack.c.b8 %v79_v59, %v79_v59  ;;  %v129_v62 = vpack.c.f32.eXmY %v127_v58, %v128_v60, 56 }
  0x53   :  { %v85_v63 = vunpack.c.0.s8 %v83_v61  ;;  %v86_v0 = vunpack.c.1.s8 %v83_v61  ;;  %v133_v1 = vpack.c.b8 %v129_v62, %v129_v62 }
  0x55   :  { %v87_v2 = vpack.c.b16 %v85_v63, %v85_v63  ;;  %v89_v3 = vpack.c.b16 %v86_v0, %v86_v0  ;;  %v135_v4 = vunpack.c.0.s8 %v133_v1  ;;  %v136_v5 = vunpack.c.1.s8 %v133_v1 }
  0x57   :  { %v88_v6 = vpack.c.b8 %v87_v2, %v87_v2  ;;  %v90_v7 = vpack.c.b8 %v89_v3, %v89_v3  ;;  %v137_v8 = vpack.c.b16 %v135_v4, %v135_v4  ;;  %v139_v9 = vpack.c.b16 %v136_v5, %v136_v5 }
  0x59   :  { %91 = vst [vmem:[#allocation7] sm:$0x3] %v88_v6  ;;  %92 = vst [vmem:[#allocation7 + $0x2] sm:$0x3] %v90_v7  ;;  %v138_v10 = vpack.c.b8 %v137_v8, %v137_v8  ;;  %v140_v11 = vpack.c.b8 %v139_v9, %v139_v9 }
  0x5a   :  { %252 = shalt.err (!%p249_p1)
}
  0x5b   :  { %s253_s21 = scalar_lea.hbm %s394_s3, 64 }
  0x5c   :  { %p254_p2 = scmp.ne.s32.totalorder %s394_s3, %s253_s21  ;;  %p257_p3 = scmp.lt.u32.totalorder %s253_s21, %s394_s3 }
  0x5e   :  { %p259_p4 = pnand %p257_p3, %p254_p2 }
  0x60   :  { %262 = shalt.err (!%p259_p4)
}
  0x61   :  { %154 = dma.vmem_to_hbm [thread:$0]  %s149_s15, 64, %s394_s3, [#allocation4], %s295_s0, %s295_s0, %s296_s9   ;;  %141 = vst [vmem:[#allocation8] sm:$0x3] %v138_v10  ;;  %142 = vst [vmem:[#allocation8 + $0x2] sm:$0x3] %v140_v11 }
  0x62   :  { %s263_s28 = scalar_lea.vmem %s354_s17, 64  ;;  %p268_p6 = scmp.lt.s32.totalorder %s354_s17, %s354_s17 }
  0x63   :  { %p264_p5 = scmp.ne.s32.totalorder %s354_s17, %s263_s28  ;;  %p269_p7 = scmp.lt.s32.totalorder %s263_s28, %s263_s28 }
  0x65   :  { %p270_p8 = por %p269_p7, %p268_p6 }
  0x67   :  { %p271_p9 = pnand %p270_p8, %p264_p5 }
  0x69   :  { %274 = shalt.err (!%p271_p9)
}
  0x6a   :  { %s275_s5 = scalar_lea.hbm %s395_s4, 64 }
  0x6b   :  { %p276_p10 = scmp.ne.s32.totalorder %s395_s4, %s275_s5  ;;  %p279_p11 = scmp.lt.u32.totalorder %s275_s5, %s395_s4 }
  0x6d   :  { %p281_p12 = pnand %p279_p11, %p276_p10 }
  0x6f   :  { %284 = shalt.err (!%p281_p12)
}
  0x70   :  { %166 = dma.vmem_to_hbm [thread:$0]  %s354_s17, 64, %s395_s4, [#allocation9], %s295_s0, %s295_s0, %s296_s9  }
  0x71   :  { %289 = dma.done.wait [#allocation4], 64  }
  0x72   :  { %290 = vsyncadd [#allocation4], 4294967232 }
  0x73   :  { %291 = dma.done.wait [#allocation9], 64  }
  0x74   :  { %292 = vsyncadd [#allocation9], 4294967232 }
  0x75   :  { %173 = vsyncpa [#allocation3], 1 }
  0x76   :  { %174 = vsyncpa [#allocation4], 1 }
  0x77   :  { %175 = vsyncpa [#allocation9], 1 }
  0x78   :  { %176 = vsyncpa [#allocation5], 1 }

</bundles_post_ra>
